<compile_context>
chip_gen: v7x
topology: tpu7x:2x2x1
jax: 0.10.0
libtpu: 0.0.40
codegen_flags: <defaults>
</compile_context>

<pallas_src>
import functools

import jax
import jax.numpy as jnp
from jax.experimental import pallas as pl
from jax.experimental.pallas import tpu as pltpu


def _round_up(a, b):
    return ((a + b - 1) // b) * b


def _dropout_kernel(x_ref, bits_ref, o_ref, *, threshold, scale):
    # bits uniform over [0, 2^32); drop iff bits < threshold, so
    # P(keep) = 1 - threshold / 2^32 = 1 - p  (matches torch's (rand > p)).
    keep = bits_ref[...] >= jnp.uint32(threshold)
    xv = x_ref[...].astype(jnp.float32)
    y = jnp.where(keep, xv * jnp.float32(scale), jnp.float32(0.0))
    o_ref[...] = y.astype(o_ref.dtype)


def dropout(x, p=0.1, key=None, training=True):
    """Pallas TPU dropout matching torch: y = x * (rand > p) / (1 - p) when training."""
    if (not training) or p == 0.0:
        return x
    if p >= 1.0:  # torch would zero everything; avoid inf scale
        return jnp.zeros_like(x)
    if key is None:
        key = jax.random.PRNGKey(0)

    orig_shape = x.shape
    n = x.size

    # Lane-dense 2-D slab; wider lane dim for big arrays -> large unmasked stores.
    LANES = 512 if n >= 512 * 8 else 128
    rows = pl.cdiv(n, LANES)
    rows = _round_up(rows, 8)                  # sublane alignment
    tile_rows = min(512, rows)                 # ~1 MiB f32 block at 512x512
    rows = _round_up(rows, tile_rows)          # whole number of blocks
    padded = rows * LANES

    xf = jnp.ravel(x)
    if padded != n:
        xf = jnp.pad(xf, (0, padded - n))
    x2d = xf.reshape(rows, LANES)

    # Independent random word per element (no per-block seed reuse issues).
    bits = jax.random.bits(key, (rows, LANES), dtype=jnp.uint32)

    threshold = min(int(round(float(p) * 2.0 ** 32)), 2 ** 32 - 1)
    scale = 1.0 / (1.0 - float(p))

    out2d = pl.pallas_call(
        functools.partial(_dropout_kernel, threshold=threshold, scale=scale),
        out_shape=jax.ShapeDtypeStruct((rows, LANES), x.dtype),
        grid=(rows // tile_rows,),
        in_specs=[
            pl.BlockSpec((tile_rows, LANES), lambda i: (i, 0)),  # x tile
            pl.BlockSpec((tile_rows, LANES), lambda i: (i, 0)),  # random bits tile
        ],
        out_specs=pl.BlockSpec((tile_rows, LANES), lambda i: (i, 0)),
        compiler_params=pltpu.CompilerParams(dimension_semantics=("parallel",)),
    )(x2d, bits)

    y = out2d.reshape(-1)
    if padded != n:
        y = y[:n]
    return y.reshape(orig_shape)


if __name__ == "__main__":
    key = jax.random.PRNGKey(0)
    kx, kd = jax.random.split(key)
    # Small NCHW input consistent with the module's elementwise forward.
    x = jax.random.normal(kx, (2, 4, 16, 16), dtype=jnp.float32)

    p = 0.1
    y = dropout(x, p=p, key=kd, training=True)
    y = jax.block_until_ready(y)

    assert y.shape == x.shape and y.dtype == x.dtype

    # Sanity: every output element is either 0 (dropped) or x / (1 - p) (kept).
    scaled = x * jnp.float32(1.0 / (1.0 - p))
    is_zero = y == 0.0
    is_scaled = jnp.abs(y - scaled) <= 1e-5 * (1.0 + jnp.abs(scaled))
    assert bool(jnp.all(is_zero | is_scaled)), "dropout output values malformed"

    # Rough statistical check on the drop fraction.
    drop_frac = float(jnp.mean(is_zero & (jnp.abs(x) > 1e-6)))
    assert 0.02 < drop_frac < 0.25, f"drop fraction {drop_frac} far from p={p}"

    # Eval mode is the identity.
    y_eval = dropout(x, p=p, key=kd, training=False)
    assert bool(jnp.all(y_eval == x))

    print("KERNEL_OK")
</pallas_src>

<mosaic_0001>
module attributes {stable_mosaic.version = 11 : i64} {
  func.func @_dropout_kernel(%arg0: i32, %arg1: memref<16x128xf32, #tpu.memory_space<vmem>>, %arg2: memref<16x128xi32, #tpu.memory_space<vmem>>, %arg3: memref<16x128xf32, #tpu.memory_space<vmem>>) attributes {dimension_semantics = [#tpu.dimension_semantics<parallel>], iteration_bounds = array<i64: 1>, scalar_prefetch = 0 : i64, scratch_operands = 0 : i64, tpu.core_type = #tpu.core_type<tc>, window_params = [{transform_indices = @transform_0, window_bounds = array<i64: 16, 128>}, {transform_indices = @transform_1, window_bounds = array<i64: 16, 128>}, {transform_indices = @transform_2, window_bounds = array<i64: 16, 128>}]} {
    %c0 = arith.constant 0 : index
    %c0_0 = arith.constant 0 : index
    %0 = vector.load %arg2[%c0, %c0_0] : memref<16x128xi32, #tpu.memory_space<vmem>>, vector<16x128xi32>
    %c429496730_i32 = arith.constant 429496730 : i32
    %1 = vector.broadcast %c429496730_i32 : i32 to vector<16x128xi32>
    %2 = arith.cmpi uge, %0, %1 : vector<16x128xi32>
    %c0_1 = arith.constant 0 : index
    %c0_2 = arith.constant 0 : index
    %3 = vector.load %arg1[%c0_1, %c0_2] : memref<16x128xf32, #tpu.memory_space<vmem>>, vector<16x128xf32>
    %cst = arith.constant 1.11111116 : f32
    %4 = vector.broadcast %cst : f32 to vector<16x128xf32>
    %5 = arith.mulf %3, %4 : vector<16x128xf32>
    %cst_3 = arith.constant 0.000000e+00 : f32
    %6 = vector.broadcast %cst_3 : f32 to vector<16x128xf32>
    %7 = arith.select %2, %5, %6 : vector<16x128xi1>, vector<16x128xf32>
    %c0_4 = arith.constant 0 : index
    %c0_5 = arith.constant 0 : index
    %8 = vector.load %arg3[%c0_4, %c0_5] : memref<16x128xf32, #tpu.memory_space<vmem>>, vector<16x128xf32>
    tpu.vector_store %arg3[%c0_4, %c0_5], %7 {strides = array<i32>} : memref<16x128xf32, #tpu.memory_space<vmem>>, vector<16x128xf32>,
    return
  }
  func.func @transform_0(%arg0: i32) -> (i32, i32) {
    %c0_i32 = arith.constant 0 : i32
    %c0_i32_0 = arith.constant 0 : i32
    return %arg0, %c0_i32 : i32, i32
  }
  func.func @transform_1(%arg0: i32) -> (i32, i32) {
    %c0_i32 = arith.constant 0 : i32
    %c0_i32_0 = arith.constant 0 : i32
    return %arg0, %c0_i32 : i32, i32
  }
  func.func @transform_2(%arg0: i32) -> (i32, i32) {
    %c0_i32 = arith.constant 0 : i32
    %c0_i32_0 = arith.constant 0 : i32
    return %arg0, %c0_i32 : i32, i32
  }
}

</mosaic_0001>

<bundles_post_ra>
// kernel: tpu_custom_call.1
= control target key start
LH: loop header
LB: loop body
LE: loop exit
PB: predicated region body
PF: predicated region fallthrough
CT: control target
= control target key end

     0   :  { %7 = vsyncpa [#allocation3], 0  ;;  %s212_s0 = inlined_call_operand.hbm [shape: f32[16,128], index: 0, kind: input, shape index: {}]   ;;  %s213_s1 = inlined_call_operand.hbm [shape: u32[16,128], index: 1, kind: input, shape index: {}]   ;;  %s214_s2 = inlined_call_operand.hbm [shape: f32[16,128], index: 2, kind: output, shape index: {}]  }
   0x1   :  { %8 = vsyncpa [#allocation6], 0 }
   0x2   :  { %9 = vsyncpa [#allocation4], 0  ;;  %s147_s9 = smov [#allocation2]   ;;  %s75_s13 = scalar_lea.hbm %s212_s0, 256 }
   0x3   :  { %s15_s10 = sshll.u32 %s147_s9, 4  ;;  %p76_p0 = scmp.ne.s32.totalorder %s212_s0, %s75_s13  ;;  %s16_s10 = int_to_ptr.vmem [resolvable:$true] %s15_s10 }
   0x4   :  { %p79_p1 = scmp.lt.u32.totalorder %s75_s13, %s212_s0 }
   0x6   :  { %p81_p2 = pnand %p79_p1, %p76_p0 }
   0x8   :  { %84 = shalt.err (!%p81_p2)
}
   0x9   :  { %s85_s18 = scalar_lea.vmem %s16_s10, 256  ;;  %p90_p4 = scmp.lt.s32.totalorder %s16_s10, %s16_s10 }
   0xa   :  { %p86_p3 = scmp.ne.s32.totalorder %s16_s10, %s85_s18  ;;  %p91_p5 = scmp.lt.s32.totalorder %s85_s18, %s85_s18 }
   0xc   :  { %p92_p6 = por %p91_p5, %p90_p4 }
   0xe   :  { %p93_p7 = pnand %p92_p6, %p86_p3 }
  0x10   :  { %96 = shalt.err (!%p93_p7)
}
  0x11   :  { %s148_s19 = smov 128   ;;  %s149_s20 = smov 8  }
  0x12   :  { %21 = dma.hbm_to_vmem [thread:$0]  %s212_s0, 256, %s16_s10, [#allocation3], %s148_s19, %s148_s19, %s149_s20  }
  0x13   :  { %s150_s23 = smov [#allocation5]   ;;  %s97_s27 = scalar_lea.hbm %s213_s1, 256 }
  0x14   :  { %s27_s24 = sshll.u32 %s150_s23, 4  ;;  %p98_p8 = scmp.ne.s32.totalorder %s213_s1, %s97_s27  ;;  %s28_s24 = int_to_ptr.vmem [resolvable:$true] %s27_s24 }
  0x15   :  { %p101_p9 = scmp.lt.u32.totalorder %s97_s27, %s213_s1 }
  0x17   :  { %p103_p10 = pnand %p101_p9, %p98_p8 }
  0x19   :  { %106 = shalt.err (!%p103_p10)
}
  0x1a   :  { %s107_s4 = scalar_lea.vmem %s28_s24, 256  ;;  %p112_p12 = scmp.lt.s32.totalorder %s28_s24, %s28_s24 }
  0x1b   :  { %p108_p11 = scmp.ne.s32.totalorder %s28_s24, %s107_s4  ;;  %p113_p13 = scmp.lt.s32.totalorder %s107_s4, %s107_s4 }
  0x1d   :  { %p114_p0 = por %p113_p13, %p112_p12 }
  0x1f   :  { %p115_p1 = pnand %p114_p0, %p108_p11 }
  0x21   :  { %118 = shalt.err (!%p115_p1)
}
  0x22   :  { %33 = dma.hbm_to_vmem [thread:$0]  %s213_s1, 256, %s28_s24, [#allocation6], %s148_s19, %s148_s19, %s149_s20  }
  0x23   :  { %141 = dma.done.wait [#allocation3], 256  }
  0x24   :  { %142 = vsyncadd [#allocation3], 4294967040 }
  0x25   :  { %143 = dma.done.wait [#allocation6], 256  }
  0x26   :  { %144 = vsyncadd [#allocation6], 4294967040  ;;  %v40_v0 = vld [vmem:[#allocation5] sm:$0xff]  ;;  %v44_v1 = vld [vmem:[#allocation2] sm:$0xff]  ;;  %s151_s6 = smov [#allocation7]  }
  0x27   :  { %v41_v2 = vld [vmem:[#allocation5 + $0x8] sm:$0xff]  ;;  %vm42_vm0 = vcmp.ge.u32.totalorder %v40_v0, 429496730  ;;  %v46_v3 = vmul.f32 1.1111112, %v44_v1  ;;  %s57_s7 = sshll.u32 %s151_s6, 4  ;;  %s58_s7 = int_to_ptr.vmem [resolvable:$true] %s57_s7 }
  0x28   :  { %vm43_vm1 = vcmp.ge.u32.totalorder %v41_v2, 429496730  ;;  %v45_v4 = vld [vmem:[#allocation2 + $0x8] sm:$0xff]  ;;  %s119_s1 = scalar_lea.vmem %s58_s7, 256  ;;  %p124_p3 = scmp.lt.s32.totalorder %s58_s7, %s58_s7 }
  0x29   :  { %v48_v5 = vsel %vm42_vm0, %v46_v3, 0.0  ;;  %v47_v6 = vmul.f32 1.1111112, %v45_v4  ;;  %p120_p2 = scmp.ne.s32.totalorder %s58_s7, %s119_s1  ;;  %p125_p4 = scmp.lt.s32.totalorder %s119_s1, %s119_s1 }
  0x2a   :  { %50 = vst [vmem:[#allocation7] sm:$0xff] %v48_v5 }
  0x2b   :  { %v49_v7 = vsel %vm43_vm1, %v47_v6, 0.0  ;;  %p126_p5 = por %p125_p4, %p124_p3 }
  0x2c   :  { %51 = vst [vmem:[#allocation7 + $0x8] sm:$0xff] %v49_v7 }
  0x2d   :  { %p127_p6 = pnand %p126_p5, %p120_p2 }
  0x2f   :  { %130 = shalt.err (!%p127_p6)
}
  0x30   :  { %s131_s10 = scalar_lea.hbm %s214_s2, 256 }
  0x31   :  { %p132_p7 = scmp.ne.s32.totalorder %s214_s2, %s131_s10  ;;  %p135_p8 = scmp.lt.u32.totalorder %s131_s10, %s214_s2 }
  0x33   :  { %p137_p9 = pnand %p135_p8, %p132_p7 }
  0x35   :  { %140 = shalt.err (!%p137_p9)
}
  0x36   :  { %63 = dma.vmem_to_hbm [thread:$0]  %s58_s7, 256, %s214_s2, [#allocation4], %s148_s19, %s148_s19, %s149_s20  }
  0x37   :  { %145 = dma.done.wait [#allocation4], 256  }
  0x38   :  { %146 = vsyncadd [#allocation4], 4294967040 }
  0x39   :  { %67 = vsyncpa [#allocation3], 1 }
  0x3a   :  { %68 = vsyncpa [#allocation6], 1 }
  0x3b   :  { %69 = vsyncpa [#allocation4], 1 }

</bundles_post_ra>
